<compile_context>
chip_gen: v7x
topology: tpu7x:2x2x1
jax: 0.10.0
libtpu: 0.0.40
codegen_flags: <defaults>
</compile_context>

<pallas_src>
import math
import functools

import jax
import jax.numpy as jnp
from jax.experimental import pallas as pl
from jax.experimental.pallas import tpu as pltpu


def _round_up(x, m):
    return ((x + m - 1) // m) * m


def _cdiv(a, b):
    return -(-a // b)


def _expnorm_kernel(dist_ref, means_ref, betas_ref, out_ref, *,
                    cutoff_lower, cutoff_upper, alpha, num_rbf, bf16_exp):
    # Lane-dense compute layout:
    #   dist_ref : (1, TILE)        input dtype (cast to f32 here, in-kernel)
    #   means_ref: (R_pad, 1)       f32, num_rbf padded to a sublane multiple
    #   betas_ref: (R_pad, 1)       f32
    #   out_ref  : (TILE, num_rbf)  torch layout, out dtype
    d = dist_ref[...].astype(jnp.float32)                    # (1, TILE)
    means = means_ref[...]                                    # (R_pad, 1)
    betas = betas_ref[...]                                    # (R_pad, 1)

    # CosineCutoff — the torch module hardcodes CosineCutoff(0, cutoff_upper)
    # (lower=0 branch), regardless of cutoff_lower.
    cut = 0.5 * (jnp.cos(d * (math.pi / cutoff_upper)) + 1.0)
    cut = cut * (d < cutoff_upper).astype(jnp.float32)        # (1, TILE)

    # exp-normal RBF, all transcendentals lane-dense.
    e = jnp.exp(alpha * (cutoff_lower - d))                   # (1, TILE)   EUP
    diff = e - means                                          # (R_pad, TILE) VALU
    arg = -betas * (diff * diff)                              # (R_pad, TILE) VALU (slack)
    if bf16_exp:
        # v6e/v7x only: packed bf16 EUP path (~2x exp throughput). Do NOT use
        # on v5e (no bf16 EUP).  Transpose below stays f32 (robust lowering).
        g = jnp.exp(arg.astype(jnp.bfloat16)).astype(jnp.float32)
    else:
        g = jnp.exp(arg)                                      # dominant EUP cost
    res = cut * g                                             # (R_pad, TILE)

    # In-kernel relayout to the torch (..., num_rbf) layout: the transpose runs
    # on the XLU and the (<128-lane, masked) store on the vst slot — both have
    # slack since the kernel is EUP-bound — replacing the old wrapper-side
    # transpose (a full HBM round trip of the output).
    res_t = jnp.transpose(res)                                # (TILE, R_pad) f32, XLU
    out_ref[...] = res_t[:, :num_rbf].astype(out_ref.dtype)


def exp_normal_smearing(dist, means, betas, *,
                        cutoff_lower=0.0, cutoff_upper=5.0,
                        tile_n=16384, out_dtype=jnp.float32,
                        bf16_exp=False):
    """Pallas implementation of ExpNormalSmearing.forward.

    dist: array of arbitrary shape.  Returns dist.shape + (num_rbf,) in the
    torch layout, written directly by the kernel (no extra relayout pass).

    Tuning notes:
      * v5e: keep bf16_exp=False (no bf16 EUP); out_dtype=jnp.bfloat16 halves
        output HBM writes if the consumer tolerates it.
      * v6e/v7x: bf16_exp=True gives ~2x on the EUP-bound exp (abs err ~1e-3).
      * tile_n default 16384 fits v7x's 64 MiB VMEM; on v5e/v6e up to 32768 is
        also fine.
    """
    num_rbf = int(means.shape[-1])
    r_pad = _round_up(num_rbf, 8)            # sublane multiple for f32 compute
    alpha = 5.0 / (cutoff_upper - cutoff_lower)

    orig_shape = dist.shape
    n = int(math.prod(orig_shape))
    dist2d = dist.reshape(1, n)              # free reshape; cast done in-kernel

    means2d = jnp.pad(means.reshape(-1).astype(jnp.float32),
                      (0, r_pad - num_rbf)).reshape(r_pad, 1)
    betas2d = jnp.pad(betas.reshape(-1).astype(jnp.float32),
                      (0, r_pad - num_rbf)).reshape(r_pad, 1)

    # Lane tile: multiple of 128, large enough to amortize ~0.35 us/grid-step.
    # Split mid-size inputs into >= 2 grid steps so the "parallel" grid axis
    # can shard across both v7x TensorCores.
    tile = max(128, _round_up(int(tile_n), 128))
    full = _round_up(max(n, 1), 128)
    tile = min(tile, full)
    if tile >= full and full > 128:
        tile = _round_up(_cdiv(n, 2), 128)
    grid = max(1, _cdiv(n, tile))            # partial boundary blocks handled by Pallas

    kernel = functools.partial(
        _expnorm_kernel,
        cutoff_lower=float(cutoff_lower),
        cutoff_upper=float(cutoff_upper),
        alpha=float(alpha),
        num_rbf=num_rbf,
        bf16_exp=bool(bf16_exp),
    )

    out = pl.pallas_call(
        kernel,
        out_shape=jax.ShapeDtypeStruct((n, num_rbf), out_dtype),
        grid_spec=pltpu.PrefetchScalarGridSpec(
            num_scalar_prefetch=0,
            grid=(grid,),
            in_specs=[
                pl.BlockSpec((1, tile), lambda i: (0, i)),        # distances (lane-dense)
                pl.BlockSpec((r_pad, 1), lambda i: (0, 0)),       # means (resident)
                pl.BlockSpec((r_pad, 1), lambda i: (0, 0)),       # betas (resident)
            ],
            out_specs=pl.BlockSpec((tile, num_rbf), lambda i: (i, 0)),  # torch layout
        ),
        compiler_params=pltpu.CompilerParams(
            dimension_semantics=("parallel",),
            vmem_limit_bytes=48 * 1024 * 1024,   # <= 64 MiB physical on v7x
        ),
    )(dist2d, means2d, betas2d)

    # (n, num_rbf) -> dist.shape + (num_rbf,): leading-dim reshape, no copy.
    return out.reshape(*orig_shape, num_rbf)


def make_params(cutoff_lower=0.0, cutoff_upper=5.0, num_rbf=50):
    """Deterministic parameter init matching ExpNormalSmearing._initial_params."""
    start_value = math.exp(-cutoff_upper + cutoff_lower)
    means = jnp.linspace(start_value, 1.0, num_rbf, dtype=jnp.float32)
    betas = jnp.full((num_rbf,),
                     (2.0 / num_rbf * (1.0 - start_value)) ** (-2),
                     dtype=jnp.float32)
    return means, betas


def _reference(dist, means, betas, cutoff_lower=0.0, cutoff_upper=5.0):
    alpha = 5.0 / (cutoff_upper - cutoff_lower)
    d = dist[..., None]
    cut = 0.5 * (jnp.cos(d * math.pi / cutoff_upper) + 1.0)
    cut = cut * (d < cutoff_upper).astype(jnp.float32)
    return cut * jnp.exp(-betas * (jnp.exp(alpha * (-d + cutoff_lower)) - means) ** 2)


if __name__ == "__main__":
    cutoff_lower, cutoff_upper, num_rbf = 0.0, 5.0, 50
    means, betas = make_params(cutoff_lower, cutoff_upper, num_rbf)

    key = jax.random.PRNGKey(0)
    k1, k2, k3 = jax.random.split(key, 3)

    cases = [
        # 128-aligned, 2 grid steps.
        jax.random.uniform(k1, (2, 128), dtype=jnp.float32,
                           minval=0.0, maxval=cutoff_upper + 1.0),
        # Non-aligned single partial block (111 distances).
        jax.random.uniform(k2, (3, 37), dtype=jnp.float32,
                           minval=0.0, maxval=cutoff_upper + 1.0),
        # Multi-step with a ragged final block (400 distances, tile 256).
        jax.random.uniform(k3, (2, 200), dtype=jnp.float32,
                           minval=0.0, maxval=cutoff_upper + 1.0),
    ]

    for dist in cases:
        out = exp_normal_smearing(dist, means, betas,
                                  cutoff_lower=cutoff_lower,
                                  cutoff_upper=cutoff_upper)
        out = jax.block_until_ready(out)
        ref = _reference(dist, means, betas, cutoff_lower, cutoff_upper)
        assert out.shape == dist.shape + (num_rbf,), (out.shape, dist.shape)
        err = float(jnp.max(jnp.abs(out - ref)))
        assert jnp.allclose(out, ref, atol=1e-5, rtol=1e-5), err

    print("KERNEL_OK")
</pallas_src>

<mosaic_0001>
module attributes {stable_mosaic.version = 11 : i64} {
  func.func @_expnorm_kernel(%arg0: i32, %arg1: memref<1x128xf32, #tpu.memory_space<vmem>>, %arg2: memref<56x1xf32, #tpu.memory_space<vmem>>, %arg3: memref<56x1xf32, #tpu.memory_space<vmem>>, %arg4: memref<128x50xf32, #tpu.memory_space<vmem>>) attributes {dimension_semantics = [#tpu.dimension_semantics<parallel>], iteration_bounds = array<i64: 2>, scalar_prefetch = 0 : i64, scratch_operands = 0 : i64, tpu.core_type = #tpu.core_type<tc>, window_params = [{transform_indices = @transform_0, window_bounds = array<i64: 1, 128>}, {pipeline_mode = #tpu.pipeline_mode<synchronous>, transform_indices = @transform_1, window_bounds = array<i64: 56, 1>}, {pipeline_mode = #tpu.pipeline_mode<synchronous>, transform_indices = @transform_2, window_bounds = array<i64: 56, 1>}, {transform_indices = @transform_3, window_bounds = array<i64: 128, 50>}]} {
    %c0 = arith.constant 0 : index
    %c0_0 = arith.constant 0 : index
    %0 = vector.load %arg1[%c0, %c0_0] : memref<1x128xf32, #tpu.memory_space<vmem>>, vector<1x128xf32>
    %c0_1 = arith.constant 0 : index
    %c0_2 = arith.constant 0 : index
    %1 = vector.load %arg2[%c0_1, %c0_2] : memref<56x1xf32, #tpu.memory_space<vmem>>, vector<56x1xf32>
    %c0_3 = arith.constant 0 : index
    %c0_4 = arith.constant 0 : index
    %2 = vector.load %arg3[%c0_3, %c0_4] : memref<56x1xf32, #tpu.memory_space<vmem>>, vector<56x1xf32>
    %cst = arith.constant 0.628318548 : f32
    %3 = vector.broadcast %cst : f32 to vector<1x128xf32>
    %4 = arith.mulf %0, %3 : vector<1x128xf32>
    %5 = math.cos %4 : vector<1x128xf32>
    %cst_5 = arith.constant 1.000000e+00 : f32
    %6 = vector.broadcast %cst_5 : f32 to vector<1x128xf32>
    %7 = arith.addf %5, %6 : vector<1x128xf32>
    %cst_6 = arith.constant 5.000000e-01 : f32
    %8 = vector.broadcast %cst_6 : f32 to vector<1x128xf32>
    %9 = arith.mulf %8, %7 : vector<1x128xf32>
    %cst_7 = arith.constant 5.000000e+00 : f32
    %10 = vector.broadcast %cst_7 : f32 to vector<1x128xf32>
    %11 = arith.cmpf olt, %0, %10 : vector<1x128xf32>
    %12 = arith.extui %11 : vector<1x128xi1> to vector<1x128xi32>
    %13 = arith.sitofp %12 : vector<1x128xi32> to vector<1x128xf32>
    %14 = arith.mulf %9, %13 : vector<1x128xf32>
    %cst_8 = arith.constant 0.000000e+00 : f32
    %15 = vector.broadcast %cst_8 : f32 to vector<1x128xf32>
    %16 = arith.subf %15, %0 : vector<1x128xf32>
    %cst_9 = arith.constant 1.000000e+00 : f32
    %17 = vector.broadcast %cst_9 : f32 to vector<1x128xf32>
    %18 = arith.mulf %17, %16 : vector<1x128xf32>
    %19 = math.exp %18 : vector<1x128xf32>
    %20 = vector.broadcast %19 : vector<1x128xf32> to vector<56x128xf32>
    %21 = vector.broadcast %1 : vector<56x1xf32> to vector<56x128xf32>
    %22 = arith.subf %20, %21 : vector<56x128xf32>
    %cst_10 = arith.constant 0.000000e+00 : f32
    %23 = vector.broadcast %cst_10 : f32 to vector<56x1xf32>
    %24 = arith.subf %23, %2 : vector<56x1xf32>
    %25 = arith.mulf %22, %22 : vector<56x128xf32>
    %26 = vector.broadcast %24 : vector<56x1xf32> to vector<56x128xf32>
    %27 = arith.mulf %26, %25 : vector<56x128xf32>
    %28 = math.exp %27 : vector<56x128xf32>
    %29 = vector.broadcast %14 : vector<1x128xf32> to vector<56x128xf32>
    %30 = arith.mulf %29, %28 : vector<56x128xf32>
    %31 = tpu.transpose %30, [1, 0] : vector<56x128xf32> -> vector<128x56xf32>
    %32 = vector.extract_strided_slice %31 {offsets = [0, 0], sizes = [128, 50], strides = [1, 1]} : vector<128x56xf32> to vector<128x50xf32>
    %c0_11 = arith.constant 0 : index
    %c0_12 = arith.constant 0 : index
    %33 = vector.load %arg4[%c0_11, %c0_12] : memref<128x50xf32, #tpu.memory_space<vmem>>, vector<128x50xf32>
    tpu.vector_store %arg4[%c0_11, %c0_12], %32 {strides = array<i32>} : memref<128x50xf32, #tpu.memory_space<vmem>>, vector<128x50xf32>,
    return
  }
  func.func @transform_0(%arg0: i32) -> (i32, i32) {
    %c0_i32 = arith.constant 0 : i32
    %c0_i32_0 = arith.constant 0 : i32
    return %c0_i32, %arg0 : i32, i32
  }
  func.func @transform_1(%arg0: i32) -> (i32, i32) {
    %c0_i32 = arith.constant 0 : i32
    %c0_i32_0 = arith.constant 0 : i32
    %c0_i32_1 = arith.constant 0 : i32
    return %c0_i32, %c0_i32_0 : i32, i32
  }
  func.func @transform_2(%arg0: i32) -> (i32, i32) {
    %c0_i32 = arith.constant 0 : i32
    %c0_i32_0 = arith.constant 0 : i32
    %c0_i32_1 = arith.constant 0 : i32
    return %c0_i32, %c0_i32_0 : i32, i32
  }
  func.func @transform_3(%arg0: i32) -> (i32, i32) {
    %c0_i32 = arith.constant 0 : i32
    %c0_i32_0 = arith.constant 0 : i32
    return %arg0, %c0_i32 : i32, i32
  }
}

</mosaic_0001>

<bundles_post_ra>
// kernel: tpu_custom_call.1
= control target key start
LH: loop header
LB: loop body
LE: loop exit
PB: predicated region body
PF: predicated region fallthrough
CT: control target
= control target key end

     0   :  { %s619_s12 = smov 0   ;;  %s746_s0 = inlined_call_operand.vmem [shape: f32[1,256], index: 0, kind: input, shape index: {}]   ;;  %s747_s1 = inlined_call_operand.vmem [shape: f32[56,1], index: 1, kind: input, shape index: {}]   ;;  %s748_s2 = inlined_call_operand.vmem [shape: f32[56,1], index: 2, kind: input, shape index: {}]   ;;  %s749_s3 = inlined_call_operand.vmem [shape: f32[256,50], index: 3, kind: output, shape index: {}]  }
   0x1 LB: > { %s625_s13 = sadd.s32 4294967295, %s589_s12   ;;  %p531_p0 = scmp.ge.s32.totalorder %s589_s12, 1  ;;  %s589_s12 = sphi %s619_s12, %s13_s12  }
   0x2   : > { %p135_p1 = scmp.lt.s32.totalorder %s589_s12, 3 }
   0x4   : > { %p136_p2 = pnand %p531_p0, %p135_p1 }
   0x5   : > { %v169_v0 = vld [vmem:[%s747_s1 + $0x10] sm:$0xff] (!%p136_p2)  ;;  %v167_v1 = vld [vmem:[%s747_s1] sm:$0xff] (!%p136_p2)  ;;  %p157_p3 = scmp.lt.s32.totalorder (!%p136_p2), %s625_s13, 1  ;;  %v591_v3 = vmov (!%p136_p2), 0   ;;  %v168_v5 = vld [vmem:[%s747_s1 + $0x8] sm:$0xff] (!%p136_p2)  ;;  %s532_s21 = sshll.u32 (!%p136_p2), %s625_s13, 4 }
   0x6   : > { %139 = sbr.rel (%p136_p2) target bundleno = 346 (0x15a), region = 32  ;;  %v174_v2 = vld [vmem:[%s748_s2] sm:$0xff] (!%p136_p2)  ;;  %562 = vset.pattern.permute.xlu1 (!%p136_p2), %v591_v3  ;;  %561 = vset.pattern.permute.xlu0 (!%p136_p2), %v591_v3  ;;  %v175_v6 = vld [vmem:[%s748_s2 + $0x8] sm:$0xff] (!%p136_p2)  ;;  %v170_v10 = vld [vmem:[%s747_s1 + $0x18] sm:$0xff] (!%p136_p2)  ;;  %v592_v33 = vmov (!%p136_p2), 683565275  }
   0x7   : > { %312 = vperm.xlu1 (!%p136_p2), %562, %v169_v0   ;;  %302 = vperm.xlu0 (!%p136_p2), %561, %v167_v1   ;;  %v342_v4 = vsub.f32 (!%p136_p2), 0.0, %v174_v2  ;;  %v343_v8 = vsub.f32 (!%p136_p2), 0.0, %v175_v6  ;;  %v176_v11 = vld [vmem:[%s748_s2 + $0x10] sm:$0xff] (!%p136_p2)  ;;  %v171_v15 = vld [vmem:[%s747_s1 + $0x20] sm:$0xff] (!%p136_p2)  ;;  %v177_v16 = vld [vmem:[%s748_s2 + $0x18] sm:$0xff] (!%p136_p2)  ;;  %p161_p4 = scmp.lt.s32.totalorder (!%p136_p2), %s532_s21, 31 }
   0x8   : > { %v344_v13 = vsub.f32 (!%p136_p2), 0.0, %v176_v11  ;;  %v345_v18 = vsub.f32 (!%p136_p2), 0.0, %v177_v16  ;;  %v178_v19 = vld [vmem:[%s748_s2 + $0x20] sm:$0xff] (!%p136_p2)  ;;  %v172_v22 = vld [vmem:[%s747_s1 + $0x28] sm:$0xff] (!%p136_p2)  ;;  %v180_v23 = vld [vmem:[%s748_s2 + $0x30] sm:$0xff] (!%p136_p2)  ;;  %vm457_vm14 = vcmask (!%p136_p2), 408576  }
   0x9   : > { %v346_v24 = vsub.f32 (!%p136_p2), 0.0, %v178_v19  ;;  %v179_v26 = vld [vmem:[%s748_s2 + $0x28] sm:$0xff] (!%p136_p2)  ;;  %v173_v29 = vld [vmem:[%s747_s1 + $0x30] sm:$0xff] (!%p136_p2)  ;;  %v348_v30 = vsub.f32 (!%p136_p2), 0.0, %v180_v23  ;;  %v593_v35 = vmov (!%p136_p2), 2475754826  }
   0xa   : > { %v347_v37 = vsub.f32 (!%p136_p2), 0.0, %v179_v26  ;;  %v594_v38 = vmov (!%p136_p2), 2131351028   ;;  %v595_v40 = vmov (!%p136_p2), 2102212464  }
   0xb   : > { %358 = vperm.xlu1 (!%p136_p2), %562, %v342_v4   ;;  %307 = vperm.xlu0 (!%p136_p2), %561, %v168_v5   ;;  %v596_v42 = vmov (!%p136_p2), 920167782   ;;  %v597_v50 = vmov (!%p136_p2), 1326507024  }
   0xd   : > { %s158_s20 = scalar_select %p157_p3, %s625_s13, 1 }
   0xe   : > { %s751_s21 = smov (!%p161_p4, %s532_s21), 31 }
   0xf   : > { %s159_s27 = scalar_lea.vmem %s746_s0, %s158_s20  ;;  %363 = vperm.xlu1 %562, %v343_v8   ;;  %317 = vperm.xlu0 %561, %v170_v10   ;;  %s533_s22 = sshll.u32 %s751_s21, 3 }
  0x10   : > { %v649_v7 = vld [vmem:[%s159_s27] sm:$0x1]  ;;  %s709_s25 = scalar_lea.vmem %s749_s3, %s533_s22 }
  0x11   : > { %v652_v9 = vmul.f32 0.62831855, %v649_v7  ;;  %vm287_vm13 = vcmp.lt.f32.partialorder %v649_v7, 5.0 }
  0x13   : > { %v185_v12 = vand.u32 2139095040, %v652_v9  ;;  %368 = vperm.xlu1 %562, %v344_v13   ;;  %322 = vperm.xlu0 %561, %v171_v15   ;;  %v182_v21 = vand.u32 2147483647, %v652_v9  ;;  %vm184_vm7 = vcmp.lt.s32.totalorder %v652_v9, 0  ;;  %vm274_vm12 = vweird.f32 %v652_v9 }
  0x15   : > { %v186_v14 = vshrl.u32 %v185_v12, 23  ;;  %v189_v28 = vand.u32 8388607, %v182_v21  ;;  %vm183_vm8 = vcmp.le.f32.partialorder %v182_v21, 0.7853982 }
  0x17   : > { %v534_v17 = vadd.s32 4294967169, %v186_v14  ;;  %373 = vperm.xlu1 %562, %v345_v18   ;;  %327 = vperm.xlu0 %561, %v172_v22   ;;  %v190_v44 = vor.u32 8388608, %v189_v28 }
  0x19   : > { %v192_v20 = vadd.s32 1, %v534_v17  ;;  %v230_v59 = vshll.u32 %v190_v44, 8 }
  0x1b   : > { %vm193_vm0 = vcmp.gt.s32.totalorder %v192_v20, 0  ;;  %378 = vperm.xlu1 %562, %v346_v24   ;;  %332 = vperm.xlu0 %561, %v173_v29  }
  0x1c   : > { %v194_v25 = vsel %vm193_vm0, %v192_v20, 0 }
  0x1d   : > { %v196_v27 = vand.u32 31, %v194_v25  ;;  %v195_v31 = vshrl.u32 %v194_v25, 5 }
  0x1f   : > { %v197_v32 = vsub.s32 32, %v196_v27  ;;  %v199_v34 = vshll.u32 %v592_v33, %v196_v27  ;;  %v202_v36 = vshll.u32 %v593_v35, %v196_v27  ;;  %v205_v39 = vshll.u32 %v594_v38, %v196_v27  ;;  %388 = vperm.xlu1 %562, %v348_v30   ;;  %383 = vperm.xlu0 %561, %v347_v37  }
  0x20   : > { %v208_v41 = vshll.u32 %v595_v40, %v196_v27  ;;  %v211_v43 = vshll.u32 %v596_v42, %v196_v27  ;;  %vm214_vm1 = vcmp.lt.s32.totalorder %v195_v31, 1  ;;  %vm217_vm2 = vcmp.lt.s32.totalorder %v195_v31, 4 }
  0x21   : > { %v198_v45 = vshrl.u32 %v592_v33, %v197_v32  ;;  %v200_v46 = vshrl.u32 %v593_v35, %v197_v32  ;;  %v203_v47 = vshrl.u32 %v594_v38, %v197_v32  ;;  %v206_v48 = vshrl.u32 %v595_v40, %v197_v32 }
  0x22   : > { %v209_v49 = vshrl.u32 %v596_v42, %v197_v32  ;;  %v212_v51 = vshrl.u32 %v597_v50, %v197_v32  ;;  %vm216_vm3 = vcmp.lt.s32.totalorder %v195_v31, 3  ;;  %vm215_vm4 = vcmp.lt.s32.totalorder %v195_v31, 2 }
  0x23   : > { %v201_v52 = vor.u32 %v200_v46, %v199_v34  ;;  %v204_v53 = vor.u32 %v203_v47, %v202_v36  ;;  %v207_v54 = vor.u32 %v206_v48, %v205_v39 }
  0x24   : > { %v210_v55 = vor.u32 %v209_v49, %v208_v41  ;;  %v213_v56 = vor.u32 %v212_v51, %v211_v43 }
  0x25   : > { %v218_v57 = vsel %vm214_vm1, %v198_v45, %v201_v52  ;;  %v222_v58 = vsel %vm214_vm1, %v201_v52, %v204_v53  ;;  %v219_v60 = vsel %vm217_vm2, %v207_v54, 2102212464  ;;  %v226_v62 = vsel %vm214_vm1, %v204_v53, %v207_v54 }
  0x26   : > { %v223_v61 = vsel %vm217_vm2, %v210_v55, 920167782  ;;  %v227_v63 = vsel %vm217_vm2, %v213_v56, 1326507024  ;;  %v220_v0 = vsel %vm216_vm3, %v204_v53, %v219_v60  ;;  %v598_v53 = vmov 0.0  }
  0x27   : > { %v224_v1 = vsel %vm216_vm3, %v207_v54, %v223_v61  ;;  %v228_v2 = vsel %vm216_vm3, %v210_v55, %v227_v63  ;;  %v221_v3 = vsel %vm215_vm4, %v218_v57, %v220_v0  ;;  %v538_v54 = vsel %vm287_vm13, 1.0, %v598_v53 }
  0x28   : > { %v225_v4 = vsel %vm215_vm4, %v222_v58, %v224_v1  ;;  %v229_v5 = vsel %vm215_vm4, %v226_v62, %v228_v2  ;;  %v237_v12 = vmul.u32 %v230_v59, %v221_v3  ;;  %v291_v57 = vsub.f32 0.0, %v649_v7 }
  0x29   : > { %v688_v6 = vmul.u32.u64.low %v230_v59, %v229_v5  ;;  %v689_v8 = vmul.u32.u64.high %v230_v59, %v229_v5, %v688_v6  ;;  %v691_v10 = vmul.u32.u64.low %v230_v59, %v225_v4  ;;  %v692_v11 = vmul.u32.u64.high %v230_v59, %v225_v4, %v691_v10 }
  0x2a   : > { %v292_v58 = vmul.f32 1.442695, %v291_v57  ;;  %v295_v59 = vlaneseq }
  0x2b   : > { %vm239_vm5 = vc.u32 %v689_v8, %v691_v10  ;;  %v240_v13 = vadd.s32 1, %v692_v11  ;;  %v238_v25 = vadd.s32 %v691_v10, %v689_v8 }
  0x2c   : > { %v296_v60 = vshrl.u32 %v295_v59, 7 }
  0x2d   : > { %v241_v14 = vsel %vm239_vm5, %v240_v13, %v692_v11 }
  0x2e   : > { %v242_v15 = vadd.s32 %v241_v14, %v237_v12  ;;  %v297_v61 = vsub.s32 0, %v296_v60 }
  0x30   : > { %v243_v16 = vadd.s32 536870912, %v242_v15 }
  0x32   : > { %v244_v17 = vshrl.u32 %v243_v16, 30 }
  0x34   : > { %v245_v18 = vshll.u32 %v244_v17, 30  ;;  %v268_v39 = vsub.s32 4, %v244_v17 }
  0x36   : > { %v246_v19 = vsub.s32 %v242_v15, %v245_v18  ;;  %v269_v42 = vsel %vm184_vm7, %v268_v39, %v244_v17 }
  0x37   : > { %v271_v43 = vsel %vm183_vm8, 0, %v269_v42 }
  0x38   : > { %v248_v20 = vsub.s32 0, %v246_v19  ;;  %v275_v44 = vand.u32 3, %v271_v43 }
  0x3a   : > { %v535_v22 = vmin.u32 %v248_v20, %v246_v19  ;;  %vm280_vm9 = vcmp.eq.s32.totalorder %v275_v44, 2  ;;  %vm277_vm10 = vcmp.eq.s32.totalorder %v275_v44, 0  ;;  %vm276_vm11 = vcmp.lt.s32.totalorder %v275_v44, 2 }
  0x3c   : > { %v250_v23 = vclz %v535_v22 }
  0x3e   : > { %v536_v24 = vadd.s32 4294967294, %v250_v23 }
  0x40   : > { %vm537_vm6 = vcmp.lt.s32.totalorder %v536_v24, 0 }
  0x41   : > { %v253_v26 = vsel %vm537_vm6, 0, %v536_v24 }
  0x42   : > { %v254_v27 = vsub.s32 32, %v253_v26  ;;  %v255_v28 = vshll.u32 %v246_v19, %v253_v26  ;;  %v258_v29 = vsub.s32 4294967266, %v253_v26 }
  0x44   : > { %v256_v30 = vshrl.u32 %v238_v25, %v254_v27  ;;  %v259_v31 = vadd.s32 127, %v258_v29 }
  0x46   : > { %v257_v32 = vor.u32 %v256_v30, %v255_v28  ;;  %v260_v33 = vshll.u32 %v259_v31, 23 }
  0x48   : > { %v261_v34 = vor.u32 4788187, %v260_v33  ;;  %v264_v35 = vcvt.s32.f32 %v257_v32 }
  0x4a   : > { %v262_v36 = vand.u32 2147483647, %v261_v34 }
  0x4c   : > { %v265_v37 = vmul.f32 %v264_v35, %v262_v36 }
  0x4e   : > { %v266_v38 = vxor.u32 2147483648, %v265_v37 }
  0x50   : > { %v267_v40 = vsel %vm184_vm7, %v266_v38, %v265_v37 }
  0x51   : > { %v270_v41 = vsel %vm183_vm8, %v652_v9, %v267_v40 }
  0x52   : > { %563 = vcosq.f32 %v270_v41 }
  0x53   : > { %565 = vsinq.f32 %v270_v41 }
  0x54   : > { %567 = vpow2.f32 %v292_v58 }
  0x5c   : > { %v564_v45 = vpop.eup %563 }
  0x5d   : > { %v566_v46 = vpop.eup %565  ;;  %v281_v47 = vxor.u32 2147483648, %v564_v45 }
  0x5e   : > { %v278_v48 = vxor.u32 2147483648, %v566_v46  ;;  %v568_v62 = vpop.eup %567 }
  0x5f   : > { %v282_v21 = vsel %vm280_vm9, %v281_v47, %v566_v46  ;;  %v298_v9 = vrot.slane %v568_v62, %v297_v61 }
  0x60   : > { %v279_v49 = vsel %vm277_vm10, %v564_v45, %v278_v48 }
  0x61   : > { %v283_v50 = vsel %vm276_vm11, %v279_v49, %v282_v21 }
  0x62   : > { %v284_v51 = vsel %vm274_vm12, nan, %v283_v50 }
  0x63   : > { %v285_v52 = vadd.f32 1.0, %v284_v51 }
  0x65   : > { %v286_v55 = vmul.f32 0.5, %v285_v52 }
  0x67   : > { %v290_v56 = vmul.f32 %v538_v54, %v286_v55 }
  0x69   : > { %v416_v26 = vrot.slane %v290_v56, %v297_v61 }
  0x86   : > { %v313_v63 = vpop.permute.xlu1 %312  ;;  %v303_v0 = vpop.permute.xlu0 %302 }
  0x87   : > { %v335_v1 = vsub.f32 %v298_v9, %v303_v0  ;;  %v337_v8 = vsub.f32 %v298_v9, %v313_v63 }
  0x89   : > { %v349_v2 = vmul.f32 %v335_v1, %v335_v1  ;;  %v351_v14 = vmul.f32 %v337_v8, %v337_v8 }
  0x8a   : > { %v359_v3 = vpop.permute.xlu1 %358  ;;  %v308_v4 = vpop.permute.xlu0 %307 }
  0x8b   : > { %v391_v5 = vmul.f32 %v359_v3, %v349_v2  ;;  %v336_v6 = vsub.f32 %v298_v9, %v308_v4 }
  0x8d   : > { %v398_v10 = vmul.f32 1.442695, %v391_v5  ;;  %v350_v11 = vmul.f32 %v336_v6, %v336_v6 }
  0x8e   : > { %v364_v12 = vpop.permute.xlu1 %363  ;;  %v318_v7 = vpop.permute.xlu0 %317 }
  0x8f   : > { %569 = vpow2.f32 %v398_v10  ;;  %v392_v13 = vmul.f32 %v364_v12, %v350_v11  ;;  %v338_v16 = vsub.f32 %v298_v9, %v318_v7 }
  0x91   : > { %v400_v15 = vmul.f32 1.442695, %v392_v13  ;;  %v352_v20 = vmul.f32 %v338_v16, %v338_v16 }
  0x92   : > { %v369_v17 = vpop.permute.xlu1 %368  ;;  %v323_v18 = vpop.permute.xlu0 %322 }
  0x93   : > { %571 = vpow2.f32 %v400_v15  ;;  %v393_v19 = vmul.f32 %v369_v17, %v351_v14  ;;  %v339_v23 = vsub.f32 %v298_v9, %v323_v18 }
  0x95   : > { %v402_v22 = vmul.f32 1.442695, %v393_v19  ;;  %v353_v29 = vmul.f32 %v339_v23, %v339_v23 }
  0x96   : > { %v374_v24 = vpop.permute.xlu1 %373  ;;  %v328_v25 = vpop.permute.xlu0 %327 }
  0x97   : > { %573 = vpow2.f32 %v402_v22  ;;  %v394_v27 = vmul.f32 %v374_v24, %v352_v20  ;;  %v340_v31 = vsub.f32 %v298_v9, %v328_v25 }
  0x99   : > { %v570_v28 = vpop.eup %569  ;;  %v404_v30 = vmul.f32 1.442695, %v394_v27  ;;  %v354_v38 = vmul.f32 %v340_v31, %v340_v31 }
  0x9a   : > { %v379_v32 = vpop.permute.xlu1 %378  ;;  %v333_v33 = vpop.permute.xlu0 %332  ;;  %v418_v34 = vmul.f32 %v570_v28, %v416_v26 }
  0x9b   : > { %575 = vpow2.f32 %v404_v30  ;;  %v395_v35 = vmul.f32 %v379_v32, %v353_v29  ;;  %v341_v36 = vsub.f32 %v298_v9, %v333_v33 }
  0x9c   : > { %425 = vxpose.xlu0.b32.start [1/7] (short) %v418_v34, 128 }
  0x9d   : > { %v572_v37 = vpop.eup %571  ;;  %v406_v39 = vmul.f32 1.442695, %v395_v35  ;;  %v355_v40 = vmul.f32 %v341_v36, %v341_v36 }
  0x9e   : > { %v389_v41 = vpop.permute.xlu1 %388  ;;  %v384_v42 = vpop.permute.xlu0 %383  ;;  %v419_v43 = vmul.f32 %v572_v37, %v416_v26 }
  0x9f   : > { %577 = vpow2.f32 %v406_v39  ;;  %v397_v44 = vmul.f32 %v389_v41, %v355_v40  ;;  %v396_v45 = vmul.f32 %v384_v42, %v354_v38 }
  0xa0   : > { %426 = vxpose.xlu0.b32.cont [2/7] (short) %v419_v43, 128 }
  0xa1   : > { %v574_v46 = vpop.eup %573  ;;  %v408_v47 = vmul.f32 1.442695, %v396_v45  ;;  %v410_v48 = vmul.f32 1.442695, %v397_v44 }
  0xa2   : > { %v420_v21 = vmul.f32 %v574_v46, %v416_v26 }
  0xa3   : > { %579 = vpow2.f32 %v408_v47 }
  0xa4   : > { %427 = vxpose.xlu0.b32.cont [3/7] (short) %v420_v21, 128  ;;  %581 = vpow2.f32 %v410_v48 }
  0xa5   : > { %v576_v49 = vpop.eup %575 }
  0xa6   : > { %v421_v50 = vmul.f32 %v576_v49, %v416_v26 }
  0xa8   : > { %428 = vxpose.xlu0.b32.cont [4/7] (short) %v421_v50, 128 }
  0xa9   : > { %v578_v51 = vpop.eup %577 }
  0xaa   : > { %v422_v52 = vmul.f32 %v578_v51, %v416_v26 }
  0xac   : > { %429 = vxpose.xlu0.b32.cont [5/7] (short) %v422_v52, 128 }
  0xad   : > { %v580_v53 = vpop.eup %579 }
  0xae   : > { %v423_v54 = vmul.f32 %v580_v53, %v416_v26  ;;  %v582_v55 = vpop.eup %581 }
  0xaf   : > { %v424_v56 = vmul.f32 %v582_v55, %v416_v26 }
  0xb0   : > { %430 = vxpose.xlu0.b32.cont [6/7] (short) %v423_v54, 128 }
  0xb4   : > { %431 = vxpose.xlu0.b32.end [7/7] (short) %v424_v56, 128 }
 0x11c   : > { %v441_v57 = vpop.trf.xlu0 }
 0x11d   : > { %458 = vst.msk [vmem:[%s709_s25] sm:$0xff] %vm457_vm14, %v441_v57 }
 0x120   : > { %v442_v58 = vpop.trf.xlu0 }
 0x121   : > { %459 = vst.msk [vmem:[%s709_s25 + $0x8] sm:$0xff] %vm457_vm14, %v442_v58 }
 0x124   : > { %v443_v59 = vpop.trf.xlu0 }
 0x125   : > { %460 = vst.msk [vmem:[%s709_s25 + $0x10] sm:$0xff] %vm457_vm14, %v443_v59 }
 0x128   : > { %v444_v60 = vpop.trf.xlu0 }
 0x129   : > { %461 = vst.msk [vmem:[%s709_s25 + $0x18] sm:$0xff] %vm457_vm14, %v444_v60 }
 0x12c   : > { %v445_v61 = vpop.trf.xlu0 }
 0x12d   : > { %462 = vst.msk [vmem:[%s709_s25 + $0x20] sm:$0xff] %vm457_vm14, %v445_v61 }
 0x130   : > { %v446_v62 = vpop.trf.xlu0 }
 0x131   : > { %463 = vst.msk [vmem:[%s709_s25 + $0x28] sm:$0xff] %vm457_vm14, %v446_v62 }
 0x134   : > { %v447_v9 = vpop.trf.xlu0 }
 0x135   : > { %464 = vst.msk [vmem:[%s709_s25 + $0x30] sm:$0xff] %vm457_vm14, %v447_v9 }
 0x138   : > { %v448_v63 = vpop.trf.xlu0 }
 0x139   : > { %465 = vst.msk [vmem:[%s709_s25 + $0x38] sm:$0xff] %vm457_vm14, %v448_v63 }
 0x13c   : > { %v449_v0 = vpop.trf.xlu0 }
 0x13d   : > { %466 = vst.msk [vmem:[%s709_s25 + $0x40] sm:$0xff] %vm457_vm14, %v449_v0 }
 0x140   : > { %v450_v1 = vpop.trf.xlu0 }
 0x141   : > { %467 = vst.msk [vmem:[%s709_s25 + $0x48] sm:$0xff] %vm457_vm14, %v450_v1 }
 0x144   : > { %v451_v2 = vpop.trf.xlu0 }
 0x145   : > { %468 = vst.msk [vmem:[%s709_s25 + $0x50] sm:$0xff] %vm457_vm14, %v451_v2 }
 0x148   : > { %v452_v3 = vpop.trf.xlu0 }
 0x149   : > { %469 = vst.msk [vmem:[%s709_s25 + $0x58] sm:$0xff] %vm457_vm14, %v452_v3 }
 0x14c   : > { %v453_v4 = vpop.trf.xlu0 }
 0x14d   : > { %470 = vst.msk [vmem:[%s709_s25 + $0x60] sm:$0xff] %vm457_vm14, %v453_v4 }
 0x150   : > { %v454_v5 = vpop.trf.xlu0 }
 0x151   : > { %471 = vst.msk [vmem:[%s709_s25 + $0x68] sm:$0xff] %vm457_vm14, %v454_v5 }
 0x154   : > { %v455_v6 = vpop.trf.xlu0 }
 0x155   : > { %472 = vst.msk [vmem:[%s709_s25 + $0x70] sm:$0xff] %vm457_vm14, %v455_v6 }
 0x158   : > { %v456_v8 = vpop.trf.xlu0 }
 0x159   : > { %473 = vst.msk [vmem:[%s709_s25 + $0x78] sm:$0xff] %vm457_vm14, %v456_v8 }
 0x15a PF: > { %s13_s12 = sadd.s32 1, %s589_s12  }
 0x15b   : > { %p10_p5 = scmp.ge.s32.totalorder %s13_s12, 4  }
 0x15d   :  { %12 = sbr.rel (!%p10_p5) target bundleno = 1 (0x1), region = 62 }

</bundles_post_ra>
